<compile_context>
chip_gen: v7x
topology: tpu7x:2x2x1
jax: 0.10.0
libtpu: 0.0.40
codegen_flags: <defaults>
</compile_context>

<pallas_src>
import functools

import jax
import jax.numpy as jnp
from jax.experimental import pallas as pl
from jax.experimental.pallas import tpu as pltpu


def _round_up(x, m):
    return ((x + m - 1) // m) * m


def _actor_kernel(s_ref, g_ref, w1a_ref, w1b_ref, w2_ref, w3_ref, b_ref,
                  out_ref):
    s = s_ref[...]                            # (TM, obs) f32
    g = g_ref[...]
    s_bf = s.astype(jnp.bfloat16)
    gs_bf = (g - s).astype(jnp.bfloat16)      # second half of concat (f32 sub)

    # fc1: concat([s, g-s]) @ W1 + b1 == s @ W1a + (g-s) @ W1b + b1
    h1 = (jnp.dot(s_bf, w1a_ref[...], preferred_element_type=jnp.float32)
          + jnp.dot(gs_bf, w1b_ref[...], preferred_element_type=jnp.float32)
          + b_ref[0:1, :])
    h1 = jnp.maximum(h1, 0.0).astype(jnp.bfloat16)

    # fc2 + relu
    h2p = w2_ref.shape[1]
    h2 = (jnp.dot(h1, w2_ref[...], preferred_element_type=jnp.float32)
          + b_ref[1:2, :h2p])
    h2 = jnp.maximum(h2, 0.0).astype(jnp.bfloat16)

    # fc3 + tanh (output emitted at true act_dim; masked 8-lane vst is cheaper
    # than a separate XLA slice launch at these sizes)
    act_dim = out_ref.shape[1]
    out = jnp.tanh(
        jnp.dot(h2, w3_ref[...], preferred_element_type=jnp.float32)
        + b_ref[2:3, :act_dim])
    out_ref[...] = out.astype(out_ref.dtype)


def init_params(key, obs_dim, act_dim, hidden_dims=(400, 300)):
    """PyTorch-style uniform fan-in init, logical (unpadded) f32 params.
    Weights are (in_features, out_features): forward computes x @ W + b."""
    h1, h2 = hidden_dims
    dims = [(2 * obs_dim, h1), (h1, h2), (h2, act_dim)]
    params = {}
    for i, (fan_in, fan_out) in enumerate(dims, start=1):
        key, kw, kb = jax.random.split(key, 3)
        bound = 1.0 / jnp.sqrt(jnp.float32(fan_in))
        params[f"w{i}"] = jax.random.uniform(
            kw, (fan_in, fan_out), jnp.float32, -bound, bound)
        params[f"b{i}"] = jax.random.uniform(
            kb, (1, fan_out), jnp.float32, -bound, bound)
    return params


def prepare_params(params, obs_dim, act_dim):
    """One-time (outside jit) param prep:
      * lane-pad hidden dims to multiples of 128 with zeros (results unchanged)
      * cast weights to bf16 (biases stay f32)
      * pre-split w1 into its [s] / [g-s] halves (no in-kernel sublane slice)
      * merge biases into a single (3, h1p) f32 array (fewer DMA streams)."""
    h1 = params["w1"].shape[1]
    h2 = params["w2"].shape[1]
    h1p = _round_up(h1, 128)          # 400 -> 512
    h2p = _round_up(h2, 128)          # 300 -> 384

    def pad2(a, rows, cols):
        return jnp.pad(a, ((0, rows - a.shape[0]), (0, cols - a.shape[1])))

    w1 = params["w1"]
    w1a = pad2(w1[:obs_dim, :], obs_dim, h1p).astype(jnp.bfloat16)
    w1b = pad2(w1[obs_dim:, :], obs_dim, h1p).astype(jnp.bfloat16)
    w2 = pad2(params["w2"], h1p, h2p).astype(jnp.bfloat16)
    w3 = pad2(params["w3"], h2p, act_dim).astype(jnp.bfloat16)  # keep act_dim cols

    b = jnp.zeros((3, h1p), jnp.float32)
    b = b.at[0, :h1].set(params["b1"][0])
    b = b.at[1, :h2].set(params["b2"][0])
    b = b.at[2, :act_dim].set(params["b3"][0])

    return {"w1a": w1a, "w1b": w1b, "w2": w2, "w3": w3, "b": b}


@jax.jit
def ddpg_actor_forward(s, g, prepared):
    """prepared: output of prepare_params (padded, bf16 weights / f32 biases).
    Returns (batch, act_dim) f32 directly (no post-kernel slice)."""
    batch, obs_dim = s.shape
    w1a, w1b = prepared["w1a"], prepared["w1b"]
    w2, w3, b = prepared["w2"], prepared["w3"], prepared["b"]
    h1p = w1a.shape[1]
    h2p = w2.shape[1]
    act_dim = w3.shape[1]

    # Batch tiling:
    #  * batch <= 128: single full-batch block (tiny latency case).
    #  * otherwise fixed 128/256-row tiles with a cdiv grid (ragged last tile
    #    is masked by Pallas). Tiles grow to 256 (MXU-matched on v6e/v7x) only
    #    when the grid still has >= 2 steps, so v7x's 2 TCs both get work.
    if batch <= 128:
        tm = batch
    else:
        tm = min(256, max(128, ((batch // 2) // 128) * 128))
    grid = (pl.cdiv(batch, tm),)

    # Advisory cost estimate so XLA can overlap this tiny latency-bound call.
    flops = 2 * batch * (2 * obs_dim * h1p + h1p * h2p + h2p * act_dim)
    transcendentals = batch * act_dim
    bytes_accessed = (
        s.size * 4 + g.size * 4 + batch * act_dim * 4
        + (w1a.size + w1b.size + w2.size + w3.size) * 2
        + b.size * 4)

    out = pl.pallas_call(
        _actor_kernel,
        out_shape=jax.ShapeDtypeStruct((batch, act_dim), jnp.float32),
        grid=grid,
        in_specs=[
            pl.BlockSpec((tm, obs_dim), lambda i: (i, 0)),        # s
            pl.BlockSpec((tm, obs_dim), lambda i: (i, 0)),        # g
            pl.BlockSpec((obs_dim, h1p), lambda i: (0, 0)),       # w1a (resident)
            pl.BlockSpec((obs_dim, h1p), lambda i: (0, 0)),       # w1b (resident)
            pl.BlockSpec((h1p, h2p), lambda i: (0, 0)),           # w2  (resident)
            pl.BlockSpec((h2p, act_dim), lambda i: (0, 0)),       # w3  (resident)
            pl.BlockSpec((3, h1p), lambda i: (0, 0)),             # merged biases
        ],
        out_specs=pl.BlockSpec((tm, act_dim), lambda i: (i, 0)),
        compiler_params=pltpu.CompilerParams(
            dimension_semantics=("parallel",)),                   # v7x: 2 TCs
        cost_estimate=pl.CostEstimate(
            flops=flops, transcendentals=transcendentals,
            bytes_accessed=bytes_accessed),
    )(s, g, w1a, w1b, w2, w3, b)

    return out


def reference_forward_f32(s, g, params):
    """Pure-f32 reference (original module semantics)."""
    sg = jnp.concatenate([s, g - s], axis=-1)
    x = jnp.maximum(sg @ params["w1"] + params["b1"], 0.0)
    x = jnp.maximum(x @ params["w2"] + params["b2"], 0.0)
    return jnp.tanh(x @ params["w3"] + params["b3"])


def reference_forward_bf16(s, g, prepared):
    """Reference with the same bf16 weights / f32 accumulation as the kernel."""
    h2p = prepared["w2"].shape[1]
    act_dim = prepared["w3"].shape[1]
    s_bf = s.astype(jnp.bfloat16)
    gs_bf = (g - s).astype(jnp.bfloat16)
    h1 = jnp.maximum(
        jnp.dot(s_bf, prepared["w1a"], preferred_element_type=jnp.float32)
        + jnp.dot(gs_bf, prepared["w1b"], preferred_element_type=jnp.float32)
        + prepared["b"][0:1, :], 0.0).astype(jnp.bfloat16)
    h2 = jnp.maximum(
        jnp.dot(h1, prepared["w2"], preferred_element_type=jnp.float32)
        + prepared["b"][1:2, :h2p], 0.0).astype(jnp.bfloat16)
    out = jnp.tanh(
        jnp.dot(h2, prepared["w3"], preferred_element_type=jnp.float32)
        + prepared["b"][2:3, :act_dim])
    return out


if __name__ == "__main__":
    key = jax.random.PRNGKey(0)
    batch, obs_dim, act_dim = 2, 16, 8
    hidden_dims = (400, 300)

    key, ks, kg, kp = jax.random.split(key, 4)
    s = jax.random.normal(ks, (batch, obs_dim), jnp.float32)
    g = jax.random.normal(kg, (batch, obs_dim), jnp.float32)
    params = init_params(kp, obs_dim, act_dim, hidden_dims)
    prepared = prepare_params(params, obs_dim, act_dim)   # once, outside jit

    out = jax.block_until_ready(ddpg_actor_forward(s, g, prepared))
    assert out.shape == (batch, act_dim)

    ref_bf16 = reference_forward_bf16(s, g, prepared)
    assert jnp.allclose(out, ref_bf16, atol=1e-3, rtol=1e-3), (
        f"bf16-matched max abs diff {jnp.max(jnp.abs(out - ref_bf16))}")

    ref_f32 = reference_forward_f32(s, g, params)
    assert jnp.allclose(out, ref_f32, atol=5e-2), (
        f"f32 max abs diff {jnp.max(jnp.abs(out - ref_f32))}")

    # Exercise the multi-step, ragged-tile grid path (weights VMEM-resident,
    # cdiv grid, masked last tile): batch=320 -> tm=128, grid=3, last tile=64.
    kb_s, kb_g = jax.random.split(key, 2)
    sb = jax.random.normal(kb_s, (320, obs_dim), jnp.float32)
    gb = jax.random.normal(kb_g, (320, obs_dim), jnp.float32)
    out_b = jax.block_until_ready(ddpg_actor_forward(sb, gb, prepared))
    ref_b = reference_forward_bf16(sb, gb, prepared)
    assert out_b.shape == (320, act_dim)
    assert jnp.allclose(out_b, ref_b, atol=1e-3, rtol=1e-3), (
        f"batched max abs diff {jnp.max(jnp.abs(out_b - ref_b))}")

    print("KERNEL_OK")
</pallas_src>

<mosaic_0001>
module attributes {stable_mosaic.version = 11 : i64} {
  func.func @_actor_kernel(%arg0: i32, %arg1: memref<2x16xf32, #tpu.memory_space<vmem>>, %arg2: memref<2x16xf32, #tpu.memory_space<vmem>>, %arg3: memref<16x512xbf16, #tpu.memory_space<vmem>>, %arg4: memref<16x512xbf16, #tpu.memory_space<vmem>>, %arg5: memref<512x384xbf16, #tpu.memory_space<vmem>>, %arg6: memref<384x8xbf16, #tpu.memory_space<vmem>>, %arg7: memref<3x512xf32, #tpu.memory_space<vmem>>, %arg8: memref<2x8xf32, #tpu.memory_space<vmem>>) attributes {dimension_semantics = [#tpu.dimension_semantics<parallel>], iteration_bounds = array<i64: 1>, scalar_prefetch = 0 : i64, scratch_operands = 0 : i64, tpu.core_type = #tpu.core_type<tc>, window_params = [{transform_indices = @transform_0, window_bounds = array<i64: 2, 16>}, {transform_indices = @transform_1, window_bounds = array<i64: 2, 16>}, {pipeline_mode = #tpu.pipeline_mode<synchronous>, transform_indices = @transform_2, window_bounds = array<i64: 16, 512>}, {pipeline_mode = #tpu.pipeline_mode<synchronous>, transform_indices = @transform_3, window_bounds = array<i64: 16, 512>}, {pipeline_mode = #tpu.pipeline_mode<synchronous>, transform_indices = @transform_4, window_bounds = array<i64: 512, 384>}, {pipeline_mode = #tpu.pipeline_mode<synchronous>, transform_indices = @transform_5, window_bounds = array<i64: 384, 8>}, {pipeline_mode = #tpu.pipeline_mode<synchronous>, transform_indices = @transform_6, window_bounds = array<i64: 3, 512>}, {transform_indices = @transform_7, window_bounds = array<i64: 2, 8>}]} {
    %c0 = arith.constant 0 : index
    %c0_0 = arith.constant 0 : index
    %0 = vector.load %arg1[%c0, %c0_0] : memref<2x16xf32, #tpu.memory_space<vmem>>, vector<2x16xf32>
    %c0_1 = arith.constant 0 : index
    %c0_2 = arith.constant 0 : index
    %1 = vector.load %arg2[%c0_1, %c0_2] : memref<2x16xf32, #tpu.memory_space<vmem>>, vector<2x16xf32>
    %2 = arith.truncf %0 : vector<2x16xf32> to vector<2x16xbf16>
    %3 = arith.subf %1, %0 : vector<2x16xf32>
    %4 = arith.truncf %3 : vector<2x16xf32> to vector<2x16xbf16>
    %c0_3 = arith.constant 0 : index
    %c0_4 = arith.constant 0 : index
    %5 = vector.load %arg3[%c0_3, %c0_4] : memref<16x512xbf16, #tpu.memory_space<vmem>>, vector<16x512xbf16>
    %cst = arith.constant dense<0.000000e+00> : vector<2x512xf32>
    %6 = tpu.matmul %2, %5, %cst {dimension_numbers = #tpu.dot_dimension_numbers<[1], [0], [0], [1], [0, 0, 1, 1], [], []>} : vector<2x16xbf16>, vector<16x512xbf16>, vector<2x512xf32> -> vector<2x512xf32>
    %c0_5 = arith.constant 0 : index
    %c0_6 = arith.constant 0 : index
    %7 = vector.load %arg4[%c0_5, %c0_6] : memref<16x512xbf16, #tpu.memory_space<vmem>>, vector<16x512xbf16>
    %cst_7 = arith.constant dense<0.000000e+00> : vector<2x512xf32>
    %8 = tpu.matmul %4, %7, %cst_7 {dimension_numbers = #tpu.dot_dimension_numbers<[1], [0], [0], [1], [0, 0, 1, 1], [], []>} : vector<2x16xbf16>, vector<16x512xbf16>, vector<2x512xf32> -> vector<2x512xf32>
    %9 = arith.addf %6, %8 : vector<2x512xf32>
    %c0_8 = arith.constant 0 : index
    %c0_9 = arith.constant 0 : index
    %10 = vector.load %arg7[%c0_8, %c0_9] : memref<3x512xf32, #tpu.memory_space<vmem>>, vector<1x512xf32>
    %11 = vector.broadcast %10 : vector<1x512xf32> to vector<2x512xf32>
    %12 = arith.addf %9, %11 : vector<2x512xf32>
    %cst_10 = arith.constant 0.000000e+00 : f32
    %13 = vector.broadcast %cst_10 : f32 to vector<2x512xf32>
    %14 = arith.maximumf %12, %13 : vector<2x512xf32>
    %15 = arith.truncf %14 : vector<2x512xf32> to vector<2x512xbf16>
    %c0_11 = arith.constant 0 : index
    %c0_12 = arith.constant 0 : index
    %16 = vector.load %arg5[%c0_11, %c0_12] : memref<512x384xbf16, #tpu.memory_space<vmem>>, vector<512x384xbf16>
    %cst_13 = arith.constant dense<0.000000e+00> : vector<2x384xf32>
    %17 = tpu.matmul %15, %16, %cst_13 {dimension_numbers = #tpu.dot_dimension_numbers<[1], [0], [0], [1], [0, 0, 1, 1], [], []>} : vector<2x512xbf16>, vector<512x384xbf16>, vector<2x384xf32> -> vector<2x384xf32>
    %c1 = arith.constant 1 : index
    %c0_14 = arith.constant 0 : index
    %18 = vector.load %arg7[%c1, %c0_14] : memref<3x512xf32, #tpu.memory_space<vmem>>, vector<1x384xf32>
    %19 = vector.broadcast %18 : vector<1x384xf32> to vector<2x384xf32>
    %20 = arith.addf %17, %19 : vector<2x384xf32>
    %cst_15 = arith.constant 0.000000e+00 : f32
    %21 = vector.broadcast %cst_15 : f32 to vector<2x384xf32>
    %22 = arith.maximumf %20, %21 : vector<2x384xf32>
    %23 = arith.truncf %22 : vector<2x384xf32> to vector<2x384xbf16>
    %c0_16 = arith.constant 0 : index
    %c0_17 = arith.constant 0 : index
    %24 = vector.load %arg6[%c0_16, %c0_17] : memref<384x8xbf16, #tpu.memory_space<vmem>>, vector<384x8xbf16>
    %cst_18 = arith.constant dense<0.000000e+00> : vector<2x8xf32>
    %25 = tpu.matmul %23, %24, %cst_18 {dimension_numbers = #tpu.dot_dimension_numbers<[1], [0], [0], [1], [0, 0, 1, 1], [], []>} : vector<2x384xbf16>, vector<384x8xbf16>, vector<2x8xf32> -> vector<2x8xf32>
    %c2 = arith.constant 2 : index
    %c0_19 = arith.constant 0 : index
    %26 = vector.load %arg7[%c2, %c0_19] : memref<3x512xf32, #tpu.memory_space<vmem>>, vector<1x8xf32>
    %27 = vector.broadcast %26 : vector<1x8xf32> to vector<2x8xf32>
    %28 = arith.addf %25, %27 : vector<2x8xf32>
    %29 = math.tanh %28 : vector<2x8xf32>
    %c0_20 = arith.constant 0 : index
    %c0_21 = arith.constant 0 : index
    %30 = vector.load %arg8[%c0_20, %c0_21] : memref<2x8xf32, #tpu.memory_space<vmem>>, vector<2x8xf32>
    tpu.vector_store %arg8[%c0_20, %c0_21], %29 {strides = array<i32>} : memref<2x8xf32, #tpu.memory_space<vmem>>, vector<2x8xf32>,
    return
  }
  func.func @transform_0(%arg0: i32) -> (i32, i32) {
    %c0_i32 = arith.constant 0 : i32
    %c0_i32_0 = arith.constant 0 : i32
    return %arg0, %c0_i32 : i32, i32
  }
  func.func @transform_1(%arg0: i32) -> (i32, i32) {
    %c0_i32 = arith.constant 0 : i32
    %c0_i32_0 = arith.constant 0 : i32
    return %arg0, %c0_i32 : i32, i32
  }
  func.func @transform_2(%arg0: i32) -> (i32, i32) {
    %c0_i32 = arith.constant 0 : i32
    %c0_i32_0 = arith.constant 0 : i32
    %c0_i32_1 = arith.constant 0 : i32
    return %c0_i32, %c0_i32_0 : i32, i32
  }
  func.func @transform_3(%arg0: i32) -> (i32, i32) {
    %c0_i32 = arith.constant 0 : i32
    %c0_i32_0 = arith.constant 0 : i32
    %c0_i32_1 = arith.constant 0 : i32
    return %c0_i32, %c0_i32_0 : i32, i32
  }
  func.func @transform_4(%arg0: i32) -> (i32, i32) {
    %c0_i32 = arith.constant 0 : i32
    %c0_i32_0 = arith.constant 0 : i32
    %c0_i32_1 = arith.constant 0 : i32
    return %c0_i32, %c0_i32_0 : i32, i32
  }
  func.func @transform_5(%arg0: i32) -> (i32, i32) {
    %c0_i32 = arith.constant 0 : i32
    %c0_i32_0 = arith.constant 0 : i32
    %c0_i32_1 = arith.constant 0 : i32
    return %c0_i32, %c0_i32_0 : i32, i32
  }
  func.func @transform_6(%arg0: i32) -> (i32, i32) {
    %c0_i32 = arith.constant 0 : i32
    %c0_i32_0 = arith.constant 0 : i32
    %c0_i32_1 = arith.constant 0 : i32
    return %c0_i32, %c0_i32_0 : i32, i32
  }
  func.func @transform_7(%arg0: i32) -> (i32, i32) {
    %c0_i32 = arith.constant 0 : i32
    %c0_i32_0 = arith.constant 0 : i32
    return %arg0, %c0_i32 : i32, i32
  }
}

</mosaic_0001>

<bundles_post_ra>
// kernel: ddpg_actor_forward.1
= control target key start
LH: loop header
LB: loop body
LE: loop exit
PB: predicated region body
PF: predicated region fallthrough
CT: control target
= control target key end

     0   :  { %12 = vsyncpa [#allocation3], 0  ;;  %s2087_s0 = inlined_call_operand.vmem [shape: f32[2,16], index: 0, kind: input, shape index: {}]   ;;  %s2088_s1 = inlined_call_operand.vmem [shape: f32[2,16], index: 1, kind: input, shape index: {}]   ;;  %s2089_s2 = inlined_call_operand.vmem [shape: bf16[16,512], index: 2, kind: input, shape index: {}]   ;;  %s2090_s3 = inlined_call_operand.vmem [shape: bf16[16,512], index: 3, kind: input, shape index: {}]   ;;  %s2091_s4 = inlined_call_operand.hbm [shape: bf16[512,384], index: 4, kind: input, shape index: {}]   ;;  %s2092_s5 = inlined_call_operand.vmem [shape: bf16[384,8], index: 5, kind: input, shape index: {}]   ;;  %s2093_s6 = inlined_call_operand.vmem [shape: f32[3,512], index: 6, kind: input, shape index: {}]   ;;  %s2094_s7 = inlined_call_operand.hbm [shape: f32[2,8], index: 7, kind: output, shape index: {}]  }
   0x1   :  { %13 = vsyncpa [#allocation4], 0  ;;  %s1877_s24 = smov [#allocation2]   ;;  %s1829_s28 = scalar_lea.hbm %s2091_s4, 12288 }
   0x2   :  { %s27_s25 = sshll.u32 %s1877_s24, 4  ;;  %p1830_p0 = scmp.ne.s32.totalorder %s2091_s4, %s1829_s28  ;;  %s28_s25 = int_to_ptr.vmem [resolvable:$true] %s27_s25 }
   0x3   :  { %p1833_p1 = scmp.lt.u32.totalorder %s1829_s28, %s2091_s4 }
   0x5   :  { %p1835_p2 = pnand %p1833_p1, %p1830_p0 }
   0x7   :  { %1838 = shalt.err (!%p1835_p2)
}
   0x8   :  { %s1839_s10 = scalar_lea.vmem %s28_s25, 12288  ;;  %p1844_p4 = scmp.lt.s32.totalorder %s28_s25, %s28_s25 }
   0x9   :  { %p1840_p3 = scmp.ne.s32.totalorder %s28_s25, %s1839_s10  ;;  %p1845_p5 = scmp.lt.s32.totalorder %s1839_s10, %s1839_s10 }
   0xb   :  { %p1846_p6 = por %p1845_p5, %p1844_p4 }
   0xd   :  { %p1847_p7 = pnand %p1846_p6, %p1840_p3 }
   0xf   :  { %1850 = shalt.err (!%p1847_p7)
}
  0x10   :  { %s1878_s11 = smov 192   ;;  %s1879_s12 = smov 12  }
  0x11   :  { %33 = dma.hbm_to_vmem [thread:$0]  %s2091_s4, 12288, %s28_s25, [#allocation3], %s1878_s11, %s1878_s11, %s1879_s12  }
  0x12   :  { %1873 = dma.done.wait [#allocation3], 12288  }
  0x13   :  { %1874 = vsyncadd [#allocation3], 4294955008  ;;  %v1880_v0 = vmov 0   ;;  %v1663_v1 = vld [vmem:[%s2090_s3 + $0x4] ss:$16 sps:$4 sm:$0xff]   ;;  %vm75_vm0 = vcmask 130048  }
  0x14   :  { %111 = vmatprep.mubr.bf16.mxu0 %v1880_v0  ;;  %152 = vmatprep.mubr.bf16.mxu1 %v1880_v0  ;;  %v1665_v2 = vld [vmem:[%s2090_s3] ss:$16 sps:$4 sm:$0xff]   ;;  %v1668_v7 = vld [vmem:[%s2089_s2 + $0x4] ss:$16 sps:$4 sm:$0xff]   ;;  %v1669_v9 = vld [vmem:[%s2090_s3 + $0xc] ss:$16 sps:$4 sm:$0xff]  }
  0x15   :  { %v42_v3 = vld [vmem:[%s2087_s0] sm:$0x3]  ;;  %79 = vmatprep.subr.bf16.mxu0 %v1663_v1  ;;  %v1671_v10 = vld [vmem:[%s2090_s3 + $0x8] ss:$16 sps:$4 sm:$0xff]   ;;  %v1674_v11 = vld [vmem:[%s2089_s2 + $0xc] ss:$16 sps:$4 sm:$0xff]   ;;  %120 = vmatprep.subr.bf16.mxu1 %v1669_v9 }
  0x16   :  { %v43_v4 = vld [vmem:[%s2088_s1] sm:$0x3]  ;;  %80 = vmatpush1.bf16.msra.mxu0 %v1665_v2  ;;  %v1677_v12 = vld [vmem:[#allocation2 + $0x4] ss:$12 sps:$4 sm:$0xff]   ;;  %121 = vmatpush1.bf16.msra.mxu1 %v1671_v10  ;;  %v1672_v13 = vld [vmem:[%s2089_s2 + $0x8] ss:$16 sps:$4 sm:$0xff]   ;;  %v44_v14 = vpack.c.bf16 %v42_v3, %v42_v3 }
  0x17   :  { %v45_v5 = vsub.f32 %v43_v4, %v42_v3  ;;  %v1666_v6 = vld [vmem:[%s2089_s2] ss:$16 sps:$4 sm:$0xff]   ;;  %184 = vmatprep.subr.bf16.mxu0 %v1668_v7  ;;  %225 = vmatprep.subr.bf16.mxu1 %v1674_v11  ;;  %v1680_v16 = vld [vmem:[#allocation2 + $0x1c] ss:$12 sps:$4 sm:$0xff]   ;;  %v1678_v17 = vld [vmem:[#allocation2 + $0x18] ss:$12 sps:$4 sm:$0xff]  }
  0x18   :  { %v1675_v15 = vld [vmem:[#allocation2] ss:$12 sps:$4 sm:$0xff]   ;;  %v1681_v19 = vld [vmem:[#allocation2 + $0x30] ss:$12 sps:$4 sm:$0xff]   ;;  %v1702_v20 = vld [vmem:[#allocation2 + $0xc8] ss:$12 sps:$4 sm:$0xff]  }
  0x19   :  { %v46_v8 = vpack.c.bf16 %v45_v5, %v45_v5  ;;  %v1683_v18 = vld [vmem:[#allocation2 + $0x34] ss:$12 sps:$4 sm:$0xff]   ;;  %v1686_v22 = vld [vmem:[#allocation2 + $0x4c] ss:$12 sps:$4 sm:$0xff]   ;;  %v1689_v26 = vld [vmem:[#allocation2 + $0x64] ss:$12 sps:$4 sm:$0xff]  }
  0x1a   :  { %v1703_v21 = vld [vmem:[#allocation2 + $0x8] ss:$12 sps:$4 sm:$0xff]   ;;  %v1707_v24 = vld [vmem:[#allocation2 + $0xe0] ss:$12 sps:$4 sm:$0xff]   ;;  %v1712_v27 = vld [vmem:[#allocation2 + $0xf8] ss:$12 sps:$4 sm:$0xff]  }
  0x1b   :  { %1425 = vmatmul.mubr.msk.bf16.vlgmr.msra.gmra.mrb[0].mxu0 %vm75_vm0, %v46_v8  ;;  %1426 = vmatmul.mubr.msk.bf16.vlgmr.msra.gmra.mrb[0].mxu1 %vm75_vm0, %v46_v8  ;;  %v1684_v23 = vld [vmem:[#allocation2 + $0x48] ss:$12 sps:$4 sm:$0xff]   ;;  %v1708_v25 = vld [vmem:[#allocation2 + $0x20] ss:$12 sps:$4 sm:$0xff]   ;;  %v1713_v28 = vld [vmem:[#allocation2 + $0x38] ss:$12 sps:$4 sm:$0xff]  }
  0x1c   :  { %185 = vmatpush1.bf16.msra.mxu0 %v1666_v6  ;;  %216 = vmatprep.mubr.bf16.mxu0 %v1880_v0  ;;  %v1687_v29 = vld [vmem:[#allocation2 + $0x60] ss:$12 sps:$4 sm:$0xff]   ;;  %v1692_v30 = vld [vmem:[#allocation2 + $0x7c] ss:$12 sps:$4 sm:$0xff]   ;;  %v1690_v32 = vld [vmem:[#allocation2 + $0x78] ss:$12 sps:$4 sm:$0xff]  }
  0x1d   :  { %958 = vmatprep.subr.bf16.mxu0 %v1677_v12  ;;  %226 = vmatpush1.bf16.msra.mxu1 %v1672_v13  ;;  %v1717_v31 = vld [vmem:[#allocation2 + $0x110] ss:$12 sps:$4 sm:$0xff]   ;;  %v1695_v34 = vld [vmem:[#allocation2 + $0x94] ss:$12 sps:$4 sm:$0xff]   ;;  %v1698_v36 = vld [vmem:[#allocation2 + $0xac] ss:$12 sps:$4 sm:$0xff]  }
  0x1e   :  { %257 = vmatprep.mubr.bf16.mxu1 %v1880_v0  ;;  %1555 = vmatprep.subr.bf16.mxu1 %v1702_v20  ;;  %v1718_v33 = vld [vmem:[#allocation2 + $0x50] ss:$12 sps:$4 sm:$0xff]   ;;  %v1696_v37 = vld [vmem:[#allocation2 + $0xa8] ss:$12 sps:$4 sm:$0xff]   ;;  %v1699_v39 = vld [vmem:[#allocation2 + $0xc0] ss:$12 sps:$4 sm:$0xff]   ;;  %v268_v0 = vlaneseq }
  0x1f   :  { %v1693_v35 = vld [vmem:[#allocation2 + $0x90] ss:$12 sps:$4 sm:$0xff]   ;;  %v1704_v41 = vld [vmem:[#allocation2 + $0xd8] ss:$12 sps:$4 sm:$0xff]   ;;  %v1711_v42 = vld [vmem:[#allocation2 + $0xf4] ss:$12 sps:$4 sm:$0xff]  }
  0x20   :  { %v1701_v38 = vld [vmem:[#allocation2 + $0xc4] ss:$12 sps:$4 sm:$0xff]   ;;  %v1706_v40 = vld [vmem:[#allocation2 + $0xdc] ss:$12 sps:$4 sm:$0xff]   ;;  %v1716_v44 = vld [vmem:[#allocation2 + $0x10c] ss:$12 sps:$4 sm:$0xff]  }
  0x21   :  { %v1709_v43 = vld [vmem:[#allocation2 + $0xf0] ss:$12 sps:$4 sm:$0xff]   ;;  %v1714_v45 = vld [vmem:[#allocation2 + $0x108] ss:$12 sps:$4 sm:$0xff]   ;;  %v1719_v48 = vld [vmem:[#allocation2 + $0x120] ss:$12 sps:$4 sm:$0xff]  }
  0x22   :  { %v1721_v46 = vld [vmem:[#allocation2 + $0x124] ss:$12 sps:$4 sm:$0xff]   ;;  %v1722_v47 = vld [vmem:[#allocation2 + $0x128] ss:$12 sps:$4 sm:$0xff]   ;;  %v1727_v52 = vld [vmem:[#allocation2 + $0x140] ss:$12 sps:$4 sm:$0xff]  }
  0x23   :  { %1431 = vmatmul.mubr.msk.bf16.vlgmr.msra.gmra.mrb[4].mxu0 %vm75_vm0, %v44_v14  ;;  %1432 = vmatmul.mubr.msk.bf16.vlgmr.msra.gmra.mrb[4].mxu1 %vm75_vm0, %v44_v14  ;;  %v1723_v49 = vld [vmem:[#allocation2 + $0x68] ss:$12 sps:$4 sm:$0xff]   ;;  %v1724_v50 = vld [vmem:[#allocation2 + $0x138] ss:$12 sps:$4 sm:$0xff]   ;;  %v1728_v53 = vld [vmem:[#allocation2 + $0x80] ss:$12 sps:$4 sm:$0xff]  }
  0x24   :  { %959 = vmatpush1.bf16.msra.mxu0 %v1675_v15  ;;  %1556 = vmatpush3.bf16.msra.mxu1 %v1703_v21  ;;  %v1726_v51 = vld [vmem:[#allocation2 + $0x13c] ss:$12 sps:$4 sm:$0xff]   ;;  %v1731_v54 = vld [vmem:[#allocation2 + $0x154] ss:$12 sps:$4 sm:$0xff]   ;;  %v1732_v56 = vld [vmem:[#allocation2 + $0x158] ss:$12 sps:$4 sm:$0xff]  }
  0x25   :  { %960 = vmatprep.subr.bf16.mxu0 %v1680_v16  ;;  %1557 = vmatprep.subr.bf16.mxu1 %v1707_v24  ;;  %v1729_v55 = vld [vmem:[#allocation2 + $0x150] ss:$12 sps:$4 sm:$0xff]   ;;  %v1733_v57 = vld [vmem:[#allocation2 + $0x98] ss:$12 sps:$4 sm:$0xff]   ;;  %v1734_v60 = vld [vmem:[#allocation2 + $0x168] ss:$12 sps:$4 sm:$0xff]  }
  0x26   :  { %v1736_v58 = vld [vmem:[#allocation2 + $0x16c] ss:$12 sps:$4 sm:$0xff]   ;;  %v1737_v59 = vld [vmem:[#allocation2 + $0x170] ss:$12 sps:$4 sm:$0xff]   ;;  %v1742_v63 = vld [vmem:[#allocation2 + $0x248] ss:$12 sps:$4 sm:$0xff]  }
  0x27   :  { %v1738_v61 = vld [vmem:[#allocation2 + $0xb0] ss:$12 sps:$4 sm:$0xff]   ;;  %v1970_v1 = vshrl.u32 %v268_v0, 7  ;;  %v1976_v7 = vld [vmem:[%s2093_s6] ss:$4 sm:$0xf] }
  0x28   :  { %961 = vmatpush1.bf16.msra.mxu0 %v1678_v17  ;;  %1558 = vmatpush3.bf16.msra.mxu1 %v1708_v25  ;;  %v1741_v62 = vld [vmem:[#allocation2 + $0x184] ss:$12 sps:$4 sm:$0xff]   ;;  %vm1882_vm1 = vmmov 0   ;;  %vm1404_vm2 = vcmask 58368  }
  0x29   :  { %962 = vmatprep.subr.bf16.mxu0 %v1683_v18  ;;  %1559 = vmatprep.subr.bf16.mxu1 %v1712_v27  ;;  %v270_v6 = vsub.s32 0, %v1970_v1  ;;  %v274_v8 = vsub.s32 1, %v1970_v1  ;;  %v282_v18 = vsub.s32 3, %v1970_v1 }
  0x2b   :  { %v271_v11 = vrot.slane %v1976_v7, %v270_v6  ;;  %v275_v14 = vrot.slane %v1976_v7, %v274_v8 }
  0x2c   :  { %963 = vmatpush1.bf16.msra.mxu0 %v1681_v19  ;;  %1560 = vmatpush3.bf16.msra.mxu1 %v1713_v28 }
  0x2d   :  { %964 = vmatprep.subr.bf16.mxu0 %v1686_v22  ;;  %1561 = vmatprep.subr.bf16.mxu1 %v1717_v31 }
  0x30   :  { %965 = vmatpush1.bf16.msra.mxu0 %v1684_v23  ;;  %1562 = vmatpush3.bf16.msra.mxu1 %v1718_v33  ;;  %v1739_v33 = vld [vmem:[#allocation2 + $0x180] ss:$12 sps:$4 sm:$0xff]  }
  0x31   :  { %966 = vmatprep.subr.bf16.mxu0 %v1689_v26  ;;  %1563 = vmatprep.subr.bf16.mxu1 %v1722_v47  ;;  %v283_v26 = vrot.slane %v1976_v7, %v282_v18  ;;  %v1753_v47 = vld [vmem:[#allocation2 + $0x1b8] ss:$12 sps:$4 sm:$0xff]  }
  0x32   :  { %v1790_v18 = vld [vmem:[#allocation2 + $0x28c] ss:$12 sps:$4 sm:$0xff]  }
  0x34   :  { %967 = vmatpush1.bf16.msra.mxu0 %v1687_v29  ;;  %1564 = vmatpush3.bf16.msra.mxu1 %v1723_v49  ;;  %v1757_v49 = vld [vmem:[#allocation2 + $0x290] ss:$12 sps:$4 sm:$0xff]  }
  0x35   :  { %968 = vmatprep.subr.bf16.mxu0 %v1692_v30  ;;  %1565 = vmatprep.subr.bf16.mxu1 %v1727_v52  ;;  %v1761_v52 = vld [vmem:[#allocation2 + $0x1e4] ss:$12 sps:$4 sm:$0xff]  }
  0x38   :  { %969 = vmatpush1.bf16.msra.mxu0 %v1690_v32  ;;  %1566 = vmatpush3.bf16.msra.mxu1 %v1728_v53  ;;  %v1762_v53 = vld [vmem:[#allocation2 + $0x2a8] ss:$12 sps:$4 sm:$0xff]  }
  0x39   :  { %970 = vmatprep.subr.bf16.mxu0 %v1695_v34  ;;  %1567 = vmatprep.subr.bf16.mxu1 %v1732_v56  ;;  %v1743_v34 = vld [vmem:[#allocation2 + $0x188] ss:$12 sps:$4 sm:$0xff]  }
  0x3a   :  { %v1763_v56 = vld [vmem:[#allocation2 + $0x1e8] ss:$12 sps:$4 sm:$0xff]  }
  0x3c   :  { %971 = vmatpush1.bf16.msra.mxu0 %v1693_v35  ;;  %1568 = vmatpush3.bf16.msra.mxu1 %v1733_v57  ;;  %v1766_v57 = vld [vmem:[#allocation2 + $0x1fc] ss:$12 sps:$4 sm:$0xff]  }
  0x3d   :  { %972 = vmatprep.subr.bf16.mxu0 %v1698_v36  ;;  %1569 = vmatprep.subr.bf16.mxu1 %v1737_v59 }
  0x40   :  { %973 = vmatpush1.bf16.msra.mxu0 %v1696_v37  ;;  %1570 = vmatpush3.bf16.msra.mxu1 %v1738_v61  ;;  %v1746_v37 = vld [vmem:[#allocation2 + $0x19c] ss:$12 sps:$4 sm:$0xff]   ;;  %v1768_v61 = vld [vmem:[#allocation2 + $0x200] ss:$12 sps:$4 sm:$0xff]  }
  0x41   :  { %974 = vmatprep.subr.bf16.mxu0 %v1701_v38  ;;  %1577 = vmatprep.subr.bf16.mxu1 %v1742_v63  ;;  %v1747_v38 = vld [vmem:[#allocation2 + $0x260] ss:$12 sps:$4 sm:$0xff]   ;;  %v1772_v63 = vld [vmem:[#allocation2 + $0x2d8] ss:$12 sps:$4 sm:$0xff]  }
  0x44   :  { %975 = vmatpush1.bf16.msra.mxu0 %v1699_v39 }
  0x45   :  { %976 = vmatprep.subr.bf16.mxu0 %v1706_v40 }
  0x48   :  { %977 = vmatpush1.bf16.msra.mxu0 %v1704_v41  ;;  %v1744_v41 = vld [vmem:[#allocation2 + $0x198] ss:$12 sps:$4 sm:$0xff]  }
  0x49   :  { %978 = vmatprep.subr.bf16.mxu0 %v1711_v42  ;;  %v1748_v42 = vld [vmem:[#allocation2 + $0x1a0] ss:$12 sps:$4 sm:$0xff]  }
  0x4c   :  { %979 = vmatpush1.bf16.msra.mxu0 %v1709_v43  ;;  %v1751_v43 = vld [vmem:[#allocation2 + $0x1b4] ss:$12 sps:$4 sm:$0xff]  }
  0x4d   :  { %980 = vmatprep.subr.bf16.mxu0 %v1716_v44  ;;  %v1752_v44 = vld [vmem:[#allocation2 + $0x278] ss:$12 sps:$4 sm:$0xff]  }
  0x50   :  { %981 = vmatpush1.bf16.msra.mxu0 %v1714_v45 }
  0x51   :  { %982 = vmatprep.subr.bf16.mxu0 %v1721_v46  ;;  %v1749_v46 = vld [vmem:[#allocation2 + $0x1b0] ss:$12 sps:$4 sm:$0xff]  }
  0x54   :  { %983 = vmatpush1.bf16.msra.mxu0 %v1719_v48  ;;  %v1756_v48 = vld [vmem:[#allocation2 + $0x1cc] ss:$12 sps:$4 sm:$0xff]  }
  0x55   :  { %984 = vmatprep.subr.bf16.mxu0 %v1726_v51  ;;  %v1758_v51 = vld [vmem:[#allocation2 + $0x1d0] ss:$12 sps:$4 sm:$0xff]  }
  0x58   :  { %985 = vmatpush1.bf16.msra.mxu0 %v1724_v50  ;;  %v1754_v50 = vld [vmem:[#allocation2 + $0x1c8] ss:$12 sps:$4 sm:$0xff]  }
  0x59   :  { %986 = vmatprep.subr.bf16.mxu0 %v1731_v54  ;;  %v278_v54 = vsub.s32 2, %v1970_v1  ;;  %v1820_v1 = vld [vmem:[%s2092_s5 + $0x88] sm:$0xff]  }
  0x5b   :  { %v279_v59 = vrot.slane %v1976_v7, %v278_v54  ;;  %v1774_v7 = vld [vmem:[#allocation2 + $0x228] ss:$12 sps:$4 sm:$0xff]  }
  0x5c   :  { %987 = vmatpush1.bf16.msra.mxu0 %v1729_v55  ;;  %v1759_v55 = vld [vmem:[#allocation2 + $0x1e0] ss:$12 sps:$4 sm:$0xff]  }
  0x5d   :  { %988 = vmatprep.subr.bf16.mxu0 %v1736_v58  ;;  %v1767_v58 = vld [vmem:[#allocation2 + $0x2c0] ss:$12 sps:$4 sm:$0xff]  }
  0x60   :  { %989 = vmatpush1.bf16.msra.mxu0 %v1734_v60  ;;  %v1764_v60 = vld [vmem:[#allocation2 + $0x1f8] ss:$12 sps:$4 sm:$0xff]  }
  0x61   :  { %999 = vmatprep.subr.bf16.mxu0 %v1741_v62  ;;  %v1771_v62 = vld [vmem:[#allocation2 + $0x214] ss:$12 sps:$4 sm:$0xff]  }
  0xee   :  { %v113_v2 = vpop.f32.mrb[0].mxu0  ;;  %v154_v9 = vpop.f32.mrb[0].mxu1 }
  0xef   :  { %v115_v3 = vpop.f32.mrb[1].mxu0  ;;  %v156_v10 = vpop.f32.mrb[1].mxu1 }
  0xf0   :  { %v117_v4 = vpop.f32.mrb[2].mxu0  ;;  %v158_v12 = vpop.f32.mrb[2].mxu1 }
  0xf1   :  { %v118_v5 = vpop.f32.mrb[3].mxu0  ;;  %v159_v15 = vpop.f32.mrb[3].mxu1  ;;  %v1776_v4 = vld [vmem:[#allocation2 + $0x22c] ss:$12 sps:$4 sm:$0xff]  }
  0xf2   :  { %v1777_v5 = vld [vmem:[#allocation2 + $0x2f0] ss:$12 sps:$4 sm:$0xff]   ;;  %v1782_v15 = vld [vmem:[#allocation2 + $0x258] ss:$12 sps:$4 sm:$0xff]  }
  0xf6   :  { %v218_v13 = vpop.f32.mrb[4].mxu0  ;;  %v259_v25 = vpop.f32.mrb[4].mxu1 }
  0xf7   :  { %v219_v16 = vadd.f32 %v218_v13, %v113_v2  ;;  %v220_v17 = vpop.f32.mrb[5].mxu0  ;;  %v260_v28 = vadd.f32 %v259_v25, %v154_v9  ;;  %v261_v29 = vpop.f32.mrb[5].mxu1  ;;  %v1769_v2 = vld [vmem:[#allocation2 + $0x210] ss:$12 sps:$4 sm:$0xff]   ;;  %v1779_v13 = vld [vmem:[#allocation2 + $0x240] ss:$12 sps:$4 sm:$0xff]  }
  0xf8   :  { %v221_v19 = vadd.f32 %v220_v17, %v115_v3  ;;  %v222_v20 = vpop.f32.mrb[6].mxu0  ;;  %v262_v30 = vadd.f32 %v261_v29, %v156_v10  ;;  %v263_v31 = vpop.f32.mrb[6].mxu1  ;;  %v1773_v3 = vld [vmem:[#allocation2 + $0x218] ss:$12 sps:$4 sm:$0xff]   ;;  %v1778_v10 = vld [vmem:[#allocation2 + $0x230] ss:$12 sps:$4 sm:$0xff]  }
  0xf9   :  { %v288_v21 = vadd.f32 %v271_v11, %v219_v16  ;;  %v223_v22 = vpop.f32.mrb[7].mxu0  ;;  %v264_v35 = vpop.f32.mrb[7].mxu1  ;;  %v290_v0 = vadd.f32 %v279_v59, %v260_v28  ;;  %v1781_v11 = vld [vmem:[#allocation2 + $0x244] ss:$12 sps:$4 sm:$0xff]   ;;  %v1787_v16 = vld [vmem:[#allocation2 + $0x274] ss:$12 sps:$4 sm:$0xff]  }
  0xfa   :  { %v289_v23 = vadd.f32 %v275_v14, %v221_v19  ;;  %v291_v39 = vadd.f32 %v283_v26, %v262_v30  ;;  %v1784_v14 = vld [vmem:[#allocation2 + $0x25c] ss:$12 sps:$4 sm:$0xff]   ;;  %v1793_v20 = vld [vmem:[#allocation2 + $0x2a4] ss:$12 sps:$4 sm:$0xff]   ;;  %v1802_v26 = vld [vmem:[#allocation2 + $0x2ec] ss:$12 sps:$4 sm:$0xff]  }
  0xfb   :  { %v292_v24 = vmax.f32 %v288_v21, 0.0  ;;  %v294_v9 = vmax.f32 %v290_v0, 0.0  ;;  %v1785_v17 = vld [vmem:[#allocation2 + $0x270] ss:$12 sps:$4 sm:$0xff]   ;;  %v1788_v19 = vld [vmem:[#allocation2 + $0x288] ss:$12 sps:$4 sm:$0xff]  }
  0xfc   :  { %v293_v27 = vmax.f32 %v289_v23, 0.0  ;;  %v295_v40 = vmax.f32 %v291_v39, 0.0  ;;  %v1791_v21 = vld [vmem:[#allocation2 + $0x2a0] ss:$12 sps:$4 sm:$0xff]   ;;  %v1796_v22 = vld [vmem:[#allocation2 + $0x2bc] ss:$12 sps:$4 sm:$0xff]  }
  0xfd   :  { %v296_v36 = vpack.c.bf16 %v292_v24, %v292_v24  ;;  %v298_v12 = vpack.c.bf16 %v294_v9, %v294_v9  ;;  %v1794_v23 = vld [vmem:[#allocation2 + $0x2b8] ss:$12 sps:$4 sm:$0xff]   ;;  %v1799_v24 = vld [vmem:[#allocation2 + $0x2d4] ss:$12 sps:$4 sm:$0xff]   ;;  %v1797_v25 = vld [vmem:[#allocation2 + $0x2d0] ss:$12 sps:$4 sm:$0xff]  }
  0xfe   :  { %v297_v32 = vpack.c.bf16 %v293_v27, %v293_v27  ;;  %v299_v45 = vpack.c.bf16 %v295_v40, %v295_v40  ;;  %v1800_v27 = vld [vmem:[#allocation2 + $0x2e8] ss:$12 sps:$4 sm:$0xff]   ;;  %v1803_v28 = vld [vmem:[%s2092_s5 + $0x40] sm:$0xff]   ;;  %v1810_v35 = vld [vmem:[%s2092_s5 + $0x18] sm:$0xff]  }
  0xff   :  { %v1804_v29 = vld [vmem:[%s2092_s5] sm:$0xff]   ;;  %v1805_v30 = vld [vmem:[%s2092_s5 + $0x48] sm:$0xff]   ;;  %v1815_v40 = vld [vmem:[%s2092_s5 + $0x70] sm:$0xff]  }
 0x100   :  { %990 = vmatprep.mubr.bf16.mxu0 %v297_v32  ;;  %1072 = vmatprep.mubr.bf16.mxu1 %v297_v32  ;;  %v1806_v31 = vld [vmem:[%s2092_s5 + $0x8] sm:$0xff]   ;;  %v1807_v32 = vld [vmem:[%s2092_s5 + $0x50] sm:$0xff]  }
 0x101   :  { %991 = vmatmul.mubr.bf16.vlgmr.msra.gmra.mrb[8].mxu0 %v296_v36  ;;  %1073 = vmatmul.mubr.bf16.vlgmr.msra.gmra.mrb[8].mxu1 %v296_v36  ;;  %v1811_v36 = vld [vmem:[%s2092_s5 + $0x60] sm:$0xff]   ;;  %v1814_v39 = vld [vmem:[%s2092_s5 + $0x28] sm:$0xff]  }
 0x102   :  { %1000 = vmatpush1.bf16.msra.mxu0 %v1739_v33  ;;  %1578 = vmatpush3.bf16.msra.mxu1 %v1743_v34  ;;  %v1808_v33 = vld [vmem:[%s2092_s5 + $0x10] sm:$0xff]   ;;  %v1809_v34 = vld [vmem:[%s2092_s5 + $0x58] sm:$0xff]  }
 0x103   :  { %1001 = vmatprep.subr.bf16.mxu0 %v1746_v37  ;;  %1579 = vmatprep.subr.bf16.mxu1 %v1747_v38  ;;  %v1812_v37 = vld [vmem:[%s2092_s5 + $0x20] sm:$0xff]   ;;  %v1813_v38 = vld [vmem:[%s2092_s5 + $0x68] sm:$0xff]  }
 0x104   :  { %1112 = vmatprep.mubr.bf16.mxu1 %v299_v45  ;;  %1031 = vmatprep.mubr.bf16.mxu0 %v299_v45 }
 0x106   :  { %1002 = vmatpush1.bf16.msra.mxu0 %v1744_v41  ;;  %1580 = vmatpush3.bf16.msra.mxu1 %v1748_v42  ;;  %v1816_v41 = vld [vmem:[%s2092_s5 + $0x30] sm:$0xff]   ;;  %v1817_v42 = vld [vmem:[%s2092_s5 + $0x78] sm:$0xff]  }
 0x107   :  { %1003 = vmatprep.subr.bf16.mxu0 %v1751_v43  ;;  %1581 = vmatprep.subr.bf16.mxu1 %v1752_v44  ;;  %v1818_v43 = vld [vmem:[%s2092_s5 + $0x38] sm:$0xff]   ;;  %v1881_v44 = vmov 0.0  }
 0x10a   :  { %1004 = vmatpush1.bf16.msra.mxu0 %v1749_v46  ;;  %1582 = vmatpush3.bf16.msra.mxu1 %v1753_v47 }
 0x10b   :  { %1005 = vmatprep.subr.bf16.mxu0 %v1756_v48  ;;  %1583 = vmatprep.subr.bf16.mxu1 %v1757_v49 }
 0x10e   :  { %1006 = vmatpush1.bf16.msra.mxu0 %v1754_v50  ;;  %1584 = vmatpush3.bf16.msra.mxu1 %v1758_v51  ;;  %v1433_v50 = vld [vmem:[%s2093_s6 + $0x1] ss:$4 sm:$0x7] }
 0x10f   :  { %1007 = vmatprep.subr.bf16.mxu0 %v1761_v52  ;;  %1585 = vmatprep.subr.bf16.mxu1 %v1762_v53  ;;  %v442_v51 = vrot.slane %v1433_v50, %v278_v54 }
 0x112   :  { %1008 = vmatpush1.bf16.msra.mxu0 %v1759_v55  ;;  %1586 = vmatpush3.bf16.msra.mxu1 %v1763_v56 }
 0x113   :  { %1009 = vmatprep.subr.bf16.mxu0 %v1766_v57  ;;  %1587 = vmatprep.subr.bf16.mxu1 %v1767_v58 }
 0x116   :  { %1010 = vmatpush1.bf16.msra.mxu0 %v1764_v60  ;;  %1588 = vmatpush3.bf16.msra.mxu1 %v1768_v61  ;;  %v434_v60 = vrot.slane %v1433_v50, %v270_v6  ;;  %v438_v61 = vrot.slane %v1433_v50, %v274_v8  ;;  %v1821_v6 = vld [vmem:[%s2092_s5 + $0x90] sm:$0xff]   ;;  %v1822_v8 = vld [vmem:[%s2092_s5 + $0x98] sm:$0xff]  }
 0x117   :  { %1011 = vmatprep.subr.bf16.mxu0 %v1771_v62  ;;  %1589 = vmatprep.subr.bf16.mxu1 %v1772_v63 }
 0x11a   :  { %1012 = vmatpush1.bf16.msra.mxu0 %v1769_v2  ;;  %1590 = vmatpush3.bf16.msra.mxu1 %v1773_v3 }
 0x11b   :  { %1013 = vmatprep.subr.bf16.mxu0 %v1776_v4  ;;  %1591 = vmatprep.subr.bf16.mxu1 %v1777_v5 }
 0x11e   :  { %1014 = vmatpush1.bf16.msra.mxu0 %v1774_v7  ;;  %1592 = vmatpush3.bf16.msra.mxu1 %v1778_v10  ;;  %v1819_v7 = vld [vmem:[%s2092_s5 + $0x80] sm:$0xff]  }
 0x11f   :  { %1015 = vmatprep.subr.bf16.mxu0 %v1781_v11  ;;  %1599 = vmatprep.subr.bf16.mxu1 %v1803_v28  ;;  %v1823_v11 = vld [vmem:[%s2092_s5 + $0xa0] sm:$0xff]  }
 0x121   :  { %1113 = vmatmul.mubr.bf16.vlgmr.msra.gmra.mrb[12].mxu1 %v298_v12 }
 0x122   :  { %1016 = vmatpush1.bf16.msra.mxu0 %v1779_v13  ;;  %1600 = vmatpush3.bf16.msra.mxu1 %v1804_v29  ;;  %v1825_v13 = vld [vmem:[%s2092_s5 + $0xb0] sm:$0xff]  }
 0x123   :  { %1017 = vmatprep.subr.bf16.mxu0 %v1784_v14  ;;  %1601 = vmatprep.subr.bf16.mxu1 %v1805_v30  ;;  %v1826_v14 = vld [vmem:[%s2092_s5 + $0xb8] sm:$0xff]  }
 0x126   :  { %1018 = vmatpush1.bf16.msra.mxu0 %v1782_v15  ;;  %1602 = vmatpush3.bf16.msra.mxu1 %v1806_v31 }
 0x127   :  { %1019 = vmatprep.subr.bf16.mxu0 %v1787_v16  ;;  %1603 = vmatprep.subr.bf16.mxu1 %v1807_v32 }
 0x12a   :  { %1020 = vmatpush1.bf16.msra.mxu0 %v1785_v17  ;;  %1604 = vmatpush3.bf16.msra.mxu1 %v1808_v33 }
 0x12b   :  { %1021 = vmatprep.subr.bf16.mxu0 %v1790_v18  ;;  %1605 = vmatprep.subr.bf16.mxu1 %v1809_v34 }
 0x12e   :  { %1022 = vmatpush1.bf16.msra.mxu0 %v1788_v19  ;;  %1606 = vmatpush3.bf16.msra.mxu1 %v1810_v35 }
 0x12f   :  { %1023 = vmatprep.subr.bf16.mxu0 %v1793_v20  ;;  %1607 = vmatprep.subr.bf16.mxu1 %v1811_v36 }
 0x132   :  { %1024 = vmatpush1.bf16.msra.mxu0 %v1791_v21  ;;  %1608 = vmatpush3.bf16.msra.mxu1 %v1812_v37 }
 0x133   :  { %1025 = vmatprep.subr.bf16.mxu0 %v1796_v22  ;;  %1609 = vmatprep.subr.bf16.mxu1 %v1813_v38  ;;  %v1530_v22 = vld [vmem:[%s2093_s6 + $0x2] ss:$0 sm:$0xff] }
 0x136   :  { %1026 = vmatpush1.bf16.msra.mxu0 %v1794_v23  ;;  %1610 = vmatpush3.bf16.msra.mxu1 %v1814_v39 }
 0x137   :  { %1027 = vmatprep.subr.bf16.mxu0 %v1799_v24  ;;  %1611 = vmatprep.subr.bf16.mxu1 %v1815_v40 }
 0x13a   :  { %1028 = vmatpush1.bf16.msra.mxu0 %v1797_v25  ;;  %1612 = vmatpush3.bf16.msra.mxu1 %v1816_v41 }
 0x13b   :  { %1029 = vmatprep.subr.bf16.mxu0 %v1802_v26  ;;  %1613 = vmatprep.subr.bf16.mxu1 %v1817_v42 }
 0x13e   :  { %1030 = vmatpush1.bf16.msra.mxu0 %v1800_v27  ;;  %1614 = vmatpush3.bf16.msra.mxu1 %v1818_v43 }
 0x13f   :  { %1630 = vmatprep.subr.bf16.mxu1 %v1881_v44 }
 0x141   :  { %1032 = vmatmul.mubr.bf16.vlgmr.msra.gmra.mrb[8].mxu0 %v298_v12  ;;  %v1824_v12 = vld [vmem:[%s2092_s5 + $0xa8] sm:$0xff]   ;;  %s1883_s5 = smov [#allocation5]  }
 0x142   :  { %s1412_s30 = sshll.u32 %s1883_s5, 4  ;;  %s1413_s30 = int_to_ptr.vmem [resolvable:$true] %s1412_s30 }
 0x143   :  { %s1851_s8 = scalar_lea.vmem %s1413_s30, 32  ;;  %p1856_p9 = scmp.lt.s32.totalorder %s1413_s30, %s1413_s30 }
 0x144   :  { %p1852_p8 = scmp.ne.s32.totalorder %s1413_s30, %s1851_s8  ;;  %p1857_p10 = scmp.lt.s32.totalorder %s1851_s8, %s1851_s8 }
 0x146   :  { %p1858_p11 = por %p1857_p10, %p1856_p9 }
 0x148   :  { %p1859_p12 = pnand %p1858_p11, %p1852_p8 }
 0x1d4   :  { %v1571_v45 = vpop.f32.mrb[8].mxu1 }
 0x1d5   :  { %v1572_v46 = vpop.f32.mrb[9].mxu1 }
 0x1d6   :  { %v1573_v47 = vadd.f32 %v1572_v46, %v1571_v45  ;;  %v1574_v48 = vpop.f32.mrb[10].mxu1 }
 0x1d7   :  { %v1575_v49 = vpop.f32.mrb[11].mxu1 }
 0x1d8   :  { %v1075_v55 = vadd.f32 %v1573_v47, %v442_v51 }
 0x1f4   :  { %v1593_v52 = vpop.f32.mrb[12].mxu1 }
 0x1f5   :  { %v1594_v53 = vpop.f32.mrb[13].mxu1 }
 0x1f6   :  { %v1595_v56 = vadd.f32 %v1594_v53, %v1593_v52  ;;  %v1596_v57 = vpop.f32.mrb[14].mxu1 }
 0x1f7   :  { %v1597_v58 = vpop.f32.mrb[15].mxu1 }
 0x1f8   :  { %v1115_v59 = vadd.f32 %v1595_v56, %v1075_v55 }
 0x1fa   :  { %v1122_v15 = vmax.f32 %v1115_v59, 0.0 }
 0x1fc   :  { %v1125_v16 = vpack.c.bf16 %v1122_v15, %v1122_v15 }
 0x214   :  { %v1033_v62 = vpop.f32.mrb[8].mxu0 }
 0x215   :  { %v1650_v63 = vadd.f32 %v1033_v62, %v434_v60  ;;  %v1035_v0 = vpop.f32.mrb[9].mxu0 }
 0x216   :  { %v1651_v2 = vadd.f32 %v1035_v0, %v438_v61  ;;  %v1037_v3 = vpop.f32.mrb[10].mxu0 }
 0x217   :  { %v1120_v4 = vmax.f32 %v1650_v63, 0.0  ;;  %v1038_v54 = vpop.f32.mrb[11].mxu0 }
 0x218   :  { %v1121_v5 = vmax.f32 %v1651_v2, 0.0 }
 0x219   :  { %v1123_v10 = vpack.c.bf16 %v1120_v4, %v1120_v4 }
 0x21a   :  { %v1124_v9 = vpack.c.bf16 %v1121_v5, %v1121_v5 }
 0x21c   :  { %1355 = vmatprep.mubr.bf16.mxu1 %v1124_v9 }
 0x21d   :  { %1356 = vmatmul.mubr.bf16.vlgmr.msra.gmra.mrb[16].mxu1 %v1123_v10 }
 0x21e   :  { %1631 = vmatpush3.bf16.msra.mxu1 %v1819_v7  ;;  %1646 = vmatprep.mubr.msk.bf16.mxu1 %vm1882_vm1, %v1881_v44 }
 0x21f   :  { %1632 = vmatprep.subr.bf16.mxu1 %v1881_v44 }
 0x222   :  { %1633 = vmatpush3.bf16.msra.mxu1 %v1820_v1 }
 0x223   :  { %1634 = vmatprep.subr.bf16.mxu1 %v1881_v44 }
 0x226   :  { %1635 = vmatpush3.bf16.msra.mxu1 %v1821_v6 }
 0x227   :  { %1636 = vmatprep.subr.bf16.mxu1 %v1881_v44 }
 0x22a   :  { %1637 = vmatpush3.bf16.msra.mxu1 %v1822_v8 }
 0x22b   :  { %1638 = vmatprep.subr.bf16.mxu1 %v1881_v44 }
 0x22e   :  { %1639 = vmatpush3.bf16.msra.mxu1 %v1823_v11 }
 0x22f   :  { %1640 = vmatprep.subr.bf16.mxu1 %v1881_v44 }
 0x232   :  { %1641 = vmatpush3.bf16.msra.mxu1 %v1824_v12 }
 0x233   :  { %1642 = vmatprep.subr.bf16.mxu1 %v1881_v44 }
 0x236   :  { %1643 = vmatpush3.bf16.msra.mxu1 %v1825_v13 }
 0x237   :  { %1644 = vmatprep.subr.bf16.mxu1 %v1881_v44 }
 0x23a   :  { %1645 = vmatpush3.bf16.msra.mxu1 %v1826_v14 }
 0x23d   :  { %1647 = vmatmul.mubr.bf16.vlgmr.msra.gmra.mrb[20].mxu1 %v1125_v16 }
 0x2f0   :  { %v1615_v17 = vpop.f32.mrb[16].mxu1 }
 0x2f1   :  { %v1616_v18 = vpop.f32.mrb[17].mxu1 }
 0x2f2   :  { %v1617_v19 = vadd.f32 %v1616_v18, %v1615_v17  ;;  %v1618_v20 = vpop.f32.mrb[18].mxu1 }
 0x2f3   :  { %v1619_v21 = vpop.f32.mrb[19].mxu1 }
 0x2f4   :  { %v1358_v23 = vadd.f32 %v1617_v19, %v1530_v22 }
 0x310   :  { %v1397_v24 = vpop.f32.mrb[20].mxu1 }
 0x311   :  { %v1398_v25 = vadd.f32 %v1397_v24, %v1358_v23  ;;  %v1648_v26 = vpop.f32.mrb[21].mxu1 }
 0x312   :  { %v1400_v27 = vpop.f32.mrb[22].mxu1 }
 0x313   :  { %1827 = vtanh.f32 %v1398_v25  ;;  %v1649_v28 = vpop.f32.mrb[23].mxu1 }
 0x31d   :  { %v1828_v29 = vpop.eup %1827 }
 0x31e   :  { %1405 = vst.msk [vmem:[#allocation5] sm:$0x3] %vm1404_vm2, %v1828_v29 }
 0x31f   :  { %1862 = shalt.err (!%p1859_p12)
}
 0x320   :  { %s1863_s3 = scalar_lea.hbm %s2094_s7, 32 }
 0x321   :  { %p1864_p13 = scmp.ne.s32.totalorder %s2094_s7, %s1863_s3  ;;  %p1867_p0 = scmp.lt.u32.totalorder %s1863_s3, %s2094_s7 }
 0x323   :  { %p1869_p1 = pnand %p1867_p0, %p1864_p13 }
 0x325   :  { %1872 = shalt.err (!%p1869_p1)
}
 0x326   :  { %1415 = dma.vmem_to_hbm [thread:$0]  %s1413_s30, 32, %s2094_s7, [#allocation4]  }
 0x327   :  { %1875 = dma.done.wait [#allocation4], 32  }
 0x328   :  { %1876 = vsyncadd [#allocation4], 4294967264 }
 0x329   :  { %1419 = vsyncpa [#allocation3], 1 }
 0x32a   :  { %1420 = vsyncpa [#allocation4], 1 }

</bundles_post_ra>
